<compile_context>
chip_gen: v6e
topology: v6e:2x2x1
jax: 0.10.0
libtpu: 0.0.40
codegen_flags: <defaults>
</compile_context>

<pallas_src>
import functools

import jax
import jax.numpy as jnp
import numpy as np
from jax.experimental import pallas as pl
from jax.experimental.pallas import tpu as pltpu


def _round_up(x, m):
    return ((x + m - 1) // m) * m


def _fused_linear_tanh_kernel(x_ref, w_ref, b_ref, o_ref, *, compute_dtype):
    # x_ref: (TM, D) input dtype, w_ref: (D, TN) compute dtype,
    # b_ref: (1, TN) f32, o_ref: (TM, TN) out dtype.
    x = x_ref[...].astype(compute_dtype)          # in-kernel cast: no HBM pass
    y = jnp.dot(x, w_ref[...], preferred_element_type=jnp.float32)
    o_ref[...] = jnp.tanh(y + b_ref[...]).astype(o_ref.dtype)


_VMEM_LIMIT_BYTES = 48 * 1024 * 1024      # < v7x's 64 MiB physical VMEM
_VMEM_BLOCK_BUDGET = 30 * 1024 * 1024     # headroom under the limit for blocks


def _choose_tiles(M, D, Hp, wbytes, out_bytes, tm_max):
    """Pick (row tile, N tile, n_tiles) under a v7x-safe VMEM budget."""
    # N (output-feature) tile: keep the resident weight slab modest.
    if D * Hp * wbytes <= 8 * 1024 * 1024:
        tn = Hp
    else:
        tn = max(256, ((8 * 1024 * 1024) // (D * wbytes)) // 256 * 256)
        tn = min(tn, Hp)
    n_tiles = pl.cdiv(Hp, tn)

    # Row tile: multiple of 16 (bf16 sublane packing), capped by VMEM.
    tm_max = max(16, (tm_max // 16) * 16)                 # sanitize caller value
    w_resident = (1 if n_tiles == 1 else 2) * (D * tn * wbytes + tn * 4)
    per_row = 2 * (D * 4 + tn * out_bytes)                # dbl-buffered x + out
    tm_cap = max(16, ((_VMEM_BLOCK_BUDGET - w_resident) // per_row) // 16 * 16)
    tm_max = min(tm_max, tm_cap)

    if M <= tm_max:
        # Single-tile case; split into 2 tiles when possible so v7x's second
        # TensorCore is not idle (no-op cost on single-TC v5e/v6e).
        tm = M if M < 32 else _round_up(pl.cdiv(M, 2), 16)
    else:
        tm = tm_max
    return tm, tn, n_tiles


def fused_linear_tanh(x, w, b, *, tm_max=1024, use_bf16_matmul=True,
                      out_dtype=jnp.float32, force_pallas=False):
    """tanh(x @ w + b) for x:(M, D), w:(D, H), b:(H,) via one pallas_call."""
    M, D = x.shape
    H = w.shape[1]
    if M == 0:
        return jnp.zeros((0, H), out_dtype)

    # Tiny problems: pad/launch/grid overhead dwarfs the FLOPs — let XLA fuse it.
    if not force_pallas and 2 * M * D * H < (1 << 21):
        y = jnp.dot(x.astype(jnp.float32), w.astype(jnp.float32),
                    preferred_element_type=jnp.float32)
        return jnp.tanh(y + b.astype(jnp.float32)).astype(out_dtype)

    compute_dtype = jnp.bfloat16 if use_bf16_matmul else jnp.float32
    wbytes = np.dtype(compute_dtype).itemsize
    out_bytes = np.dtype(out_dtype).itemsize

    Hp = _round_up(H, 128)                         # lane-dense weights / stores
    tm, tn, n_tiles = _choose_tiles(M, D, Hp, wbytes, out_bytes, tm_max)
    row_tiles = pl.cdiv(M, tm)

    # One-time weight/bias prep (cast + optional lane pad).  Activations stay
    # untouched in HBM: block (tm, D) with D == full dim is legal, and the
    # bf16 cast happens in-register inside the kernel.
    if Hp == H:
        w_p = w.astype(compute_dtype)
        b_p = b.astype(jnp.float32).reshape(1, H)
    else:
        w_p = jnp.zeros((D, Hp), compute_dtype).at[:, :H].set(
            w.astype(compute_dtype))
        b_p = jnp.zeros((1, Hp), jnp.float32).at[0, :H].set(
            b.astype(jnp.float32))

    kernel = functools.partial(_fused_linear_tanh_kernel,
                               compute_dtype=compute_dtype)
    cost = pl.CostEstimate(
        flops=2 * M * D * Hp,
        transcendentals=M * Hp,
        bytes_accessed=(x.size * x.dtype.itemsize + w_p.size * wbytes
                        + b_p.size * 4 + M * Hp * out_bytes),
    )

    def run(single_buffer_wb):
        wb_kwargs = ({"pipeline_mode": pl.Buffered(1)}
                     if single_buffer_wb else {})
        return pl.pallas_call(
            kernel,
            out_shape=jax.ShapeDtypeStruct((M, Hp), out_dtype),
            grid=(n_tiles, row_tiles),             # rows innermost; independent
            in_specs=[
                pl.BlockSpec((tm, D), lambda j, i: (i, 0)),           # x rows
                pl.BlockSpec((D, tn), lambda j, i: (0, j), **wb_kwargs),  # w
                pl.BlockSpec((1, tn), lambda j, i: (0, j), **wb_kwargs),  # b
            ],
            out_specs=pl.BlockSpec((tm, tn), lambda j, i: (i, j)),
            compiler_params=pltpu.CompilerParams(
                dimension_semantics=("parallel", "parallel"),
                vmem_limit_bytes=_VMEM_LIMIT_BYTES,
            ),
            cost_estimate=cost,
        )(x, w_p, b_p)

    if n_tiles == 1:
        # Weights/bias have a constant index_map: single-buffer them to halve
        # their VMEM footprint (matters on v7x).  Fall back to the default
        # double-buffering if this jax build rejects Buffered(1).
        try:
            out = run(True)
        except Exception:
            out = run(False)
    else:
        out = run(False)       # weight slabs stream over j: keep double-buffered

    return out if Hp == H else out[:, :H]


def triplet_net_batch_mix_forward(anchor, positive, w, b, **kwargs):
    """Mirrors TripletNetBatchMix.forward.

    anchor, positive: (B, S, D); w: (D, H); b: (H,). Returns (2*(B//2-1), H).
    """
    B = anchor.shape[0]
    H = w.shape[1]
    half = B // 2
    k = half - 1
    if k <= 0:
        # Matches PyTorch: empty slices -> empty concat.
        return jnp.zeros((0, H), kwargs.get("out_dtype", jnp.float32))

    # Only the surviving rows are computed: last timestep of the first
    # (half-1) samples of each branch, stacked anchor-then-positive so the
    # kernel output is already in the final concatenated layout.
    rows = jnp.concatenate((anchor[:k, -1, :], positive[:k, -1, :]), axis=0)
    return fused_linear_tanh(rows, w, b, **kwargs)


if __name__ == "__main__":
    # Small shapes: batch=34 (half=17 -> 16 rows per branch, M=32 total),
    # seq=8, input feature dim=128, hidden=256.
    B, S, D, H = 34, 8, 128, 256

    key = jax.random.PRNGKey(0)
    k_a, k_p, k_w, k_b = jax.random.split(key, 4)

    anchor = jax.random.normal(k_a, (B, S, D), dtype=jnp.float32)
    positive = jax.random.normal(k_p, (B, S, D), dtype=jnp.float32)

    # Deterministic "network" parameters (Linear D -> H).
    w = jax.random.normal(k_w, (D, H), dtype=jnp.float32) * 0.05
    b = jax.random.normal(k_b, (H,), dtype=jnp.float32) * 0.1

    # Reference in plain JAX (full-sequence network, then slice + concat,
    # exactly like the PyTorch module).
    def ref_network(x):
        return jnp.tanh(jnp.einsum("bsd,dh->bsh", x, w,
                                   precision=jax.lax.Precision.HIGHEST) + b)

    half = B // 2
    ref = jnp.concatenate(
        (ref_network(anchor)[0:half - 1, -1],
         ref_network(positive)[0:half - 1, -1]),
        axis=0,
    )

    # f32 MXU path: tight check against the f32 reference.
    out_f32 = triplet_net_batch_mix_forward(
        anchor, positive, w, b, use_bf16_matmul=False, force_pallas=True)
    out_f32 = jax.block_until_ready(out_f32)
    assert out_f32.shape == (2 * (half - 1), H), out_f32.shape
    assert jnp.allclose(out_f32, ref, atol=5e-4, rtol=5e-4), \
        float(jnp.max(jnp.abs(out_f32 - ref)))

    # Default bf16 MXU path (f32 accumulation): looser tolerance.
    out_bf16 = triplet_net_batch_mix_forward(
        anchor, positive, w, b, force_pallas=True)
    out_bf16 = jax.block_until_ready(out_bf16)
    assert out_bf16.shape == (2 * (half - 1), H), out_bf16.shape
    assert jnp.allclose(out_bf16, ref, atol=3e-2, rtol=3e-2), \
        float(jnp.max(jnp.abs(out_bf16 - ref)))

    print("KERNEL_OK")
</pallas_src>

<mosaic_0001>
module attributes {stable_mosaic.version = 11 : i64} {
  func.func @_fused_linear_tanh_kernel(%arg0: i32, %arg1: i32, %arg2: memref<16x128xf32, #tpu.memory_space<vmem>>, %arg3: memref<128x256xf32, #tpu.memory_space<vmem>>, %arg4: memref<1x256xf32, #tpu.memory_space<vmem>>, %arg5: memref<16x256xf32, #tpu.memory_space<vmem>>) attributes {dimension_semantics = [#tpu.dimension_semantics<parallel>, #tpu.dimension_semantics<parallel>], iteration_bounds = array<i64: 1, 2>, scalar_prefetch = 0 : i64, scratch_operands = 0 : i64, tpu.core_type = #tpu.core_type<tc>, window_params = [{transform_indices = @transform_0, window_bounds = array<i64: 16, 128>}, {pipeline_mode = #tpu.pipeline_mode<synchronous>, transform_indices = @transform_1, window_bounds = array<i64: 128, 256>}, {pipeline_mode = #tpu.pipeline_mode<synchronous>, transform_indices = @transform_2, window_bounds = array<i64: 1, 256>}, {transform_indices = @transform_3, window_bounds = array<i64: 16, 256>}]} {
    %c0 = arith.constant 0 : index
    %c0_0 = arith.constant 0 : index
    %0 = vector.load %arg2[%c0, %c0_0] : memref<16x128xf32, #tpu.memory_space<vmem>>, vector<16x128xf32>
    %c0_1 = arith.constant 0 : index
    %c0_2 = arith.constant 0 : index
    %1 = vector.load %arg3[%c0_1, %c0_2] : memref<128x256xf32, #tpu.memory_space<vmem>>, vector<128x256xf32>
    %cst = arith.constant dense<0.000000e+00> : vector<16x256xf32>
    %2 = tpu.matmul %0, %1, %cst {dimension_numbers = #tpu.dot_dimension_numbers<[1], [0], [0], [1], [0, 0, 1, 1], [], []>} : vector<16x128xf32>, vector<128x256xf32>, vector<16x256xf32> -> vector<16x256xf32>
    %c0_3 = arith.constant 0 : index
    %c0_4 = arith.constant 0 : index
    %3 = vector.load %arg4[%c0_3, %c0_4] : memref<1x256xf32, #tpu.memory_space<vmem>>, vector<1x256xf32>
    %4 = vector.broadcast %3 : vector<1x256xf32> to vector<16x256xf32>
    %5 = arith.addf %2, %4 : vector<16x256xf32>
    %6 = math.tanh %5 : vector<16x256xf32>
    %c0_5 = arith.constant 0 : index
    %c0_6 = arith.constant 0 : index
    %7 = vector.load %arg5[%c0_5, %c0_6] : memref<16x256xf32, #tpu.memory_space<vmem>>, vector<16x256xf32>
    tpu.vector_store %arg5[%c0_5, %c0_6], %6 {strides = array<i32>} : memref<16x256xf32, #tpu.memory_space<vmem>>, vector<16x256xf32>,
    return
  }
  func.func @transform_0(%arg0: i32, %arg1: i32) -> (i32, i32) {
    %c0_i32 = arith.constant 0 : i32
    %c0_i32_0 = arith.constant 0 : i32
    return %arg1, %c0_i32 : i32, i32
  }
  func.func @transform_1(%arg0: i32, %arg1: i32) -> (i32, i32) {
    %c0_i32 = arith.constant 0 : i32
    %c0_i32_0 = arith.constant 0 : i32
    return %c0_i32, %arg0 : i32, i32
  }
  func.func @transform_2(%arg0: i32, %arg1: i32) -> (i32, i32) {
    %c0_i32 = arith.constant 0 : i32
    %c0_i32_0 = arith.constant 0 : i32
    return %c0_i32, %arg0 : i32, i32
  }
  func.func @transform_3(%arg0: i32, %arg1: i32) -> (i32, i32) {
    %c0_i32 = arith.constant 0 : i32
    return %arg1, %arg0 : i32, i32
  }
}

module attributes {stable_mosaic.version = 11 : i64} {
  func.func @_fused_linear_tanh_kernel(%arg0: i32, %arg1: i32, %arg2: memref<16x128xf32, #tpu.memory_space<vmem>>, %arg3: memref<128x256xf32, #tpu.memory_space<vmem>>, %arg4: memref<1x256xf32, #tpu.memory_space<vmem>>, %arg5: memref<16x256xf32, #tpu.memory_space<vmem>>) attributes {dimension_semantics = [#tpu.dimension_semantics<parallel>, #tpu.dimension_semantics<parallel>], iteration_bounds = array<i64: 1, 2>, scalar_prefetch = 0 : i64, scratch_operands = 0 : i64, tpu.core_type = #tpu.core_type<tc>, window_params = [{transform_indices = @transform_0, window_bounds = array<i64: 16, 128>}, {transform_indices = @transform_1, window_bounds = array<i64: 128, 256>}, {transform_indices = @transform_2, window_bounds = array<i64: 1, 256>}, {transform_indices = @transform_3, window_bounds = array<i64: 16, 256>}]} {
    %c0 = arith.constant 0 : index
    %c0_0 = arith.constant 0 : index
    %0 = vector.load %arg2[%c0, %c0_0] : memref<16x128xf32, #tpu.memory_space<vmem>>, vector<16x128xf32>
    %c0_1 = arith.constant 0 : index
    %c0_2 = arith.constant 0 : index
    %1 = vector.load %arg3[%c0_1, %c0_2] : memref<128x256xf32, #tpu.memory_space<vmem>>, vector<128x256xf32>
    %cst = arith.constant dense<0.000000e+00> : vector<16x256xf32>
    %2 = tpu.matmul %0, %1, %cst {dimension_numbers = #tpu.dot_dimension_numbers<[1], [0], [0], [1], [0, 0, 1, 1], [], []>} : vector<16x128xf32>, vector<128x256xf32>, vector<16x256xf32> -> vector<16x256xf32>
    %c0_3 = arith.constant 0 : index
    %c0_4 = arith.constant 0 : index
    %3 = vector.load %arg4[%c0_3, %c0_4] : memref<1x256xf32, #tpu.memory_space<vmem>>, vector<1x256xf32>
    %4 = vector.broadcast %3 : vector<1x256xf32> to vector<16x256xf32>
    %5 = arith.addf %2, %4 : vector<16x256xf32>
    %6 = math.tanh %5 : vector<16x256xf32>
    %c0_5 = arith.constant 0 : index
    %c0_6 = arith.constant 0 : index
    %7 = vector.load %arg5[%c0_5, %c0_6] : memref<16x256xf32, #tpu.memory_space<vmem>>, vector<16x256xf32>
    tpu.vector_store %arg5[%c0_5, %c0_6], %6 {strides = array<i32>} : memref<16x256xf32, #tpu.memory_space<vmem>>, vector<16x256xf32>,
    return
  }
  func.func @transform_0(%arg0: i32, %arg1: i32) -> (i32, i32) {
    %c0_i32 = arith.constant 0 : i32
    %c0_i32_0 = arith.constant 0 : i32
    return %arg1, %c0_i32 : i32, i32
  }
  func.func @transform_1(%arg0: i32, %arg1: i32) -> (i32, i32) {
    %c0_i32 = arith.constant 0 : i32
    %c0_i32_0 = arith.constant 0 : i32
    return %c0_i32, %arg0 : i32, i32
  }
  func.func @transform_2(%arg0: i32, %arg1: i32) -> (i32, i32) {
    %c0_i32 = arith.constant 0 : i32
    %c0_i32_0 = arith.constant 0 : i32
    return %c0_i32, %arg0 : i32, i32
  }
  func.func @transform_3(%arg0: i32, %arg1: i32) -> (i32, i32) {
    %c0_i32 = arith.constant 0 : i32
    return %arg1, %arg0 : i32, i32
  }
}

</mosaic_0001>

<bundles_post_ra>
// kernel: tpu_custom_call.1
= control target key start
LH: loop header
LB: loop body
LE: loop exit
PB: predicated region body
PF: predicated region fallthrough
CT: control target
= control target key end

     0   :  { %8 = vsyncpa [#allocation3], 0  ;;  %s1006_s0 = inlined_call_operand.hbm [shape: f32[32,128], index: 0, kind: input, shape index: {}]   ;;  %s1007_s1 = inlined_call_operand.hbm [shape: f32[128,256], index: 1, kind: input, shape index: {}]   ;;  %s1008_s2 = inlined_call_operand.vmem [shape: f32[1,256], index: 2, kind: input, shape index: {}]   ;;  %s1009_s3 = inlined_call_operand.hbm [shape: f32[32,256], index: 3, kind: output, shape index: {}]  }
   0x1   :  { %10 = vsyncpa [#allocation3 + $0x1], 0 }
   0x2   :  { %11 = vsyncpa [#allocation6], 0 }
   0x3   :  { %12 = vsyncpa [#allocation4], 0 }
   0x4   :  { %14 = vsyncpa [#allocation4 + $0x1], 0  ;;  %s817_s12 = smov 0   ;;  %s819_s13 = smov 0  }
   0x5   :  { %s821_s14 = smov 0   ;;  %s823_s15 = smov 0  }
   0x6   :  { %s825_s16 = smov 0   ;;  %s827_s17 = smov 0  }
   0x7 LB: > { %s505_s18 = sadd.s32 4294967295, %s785_s17   ;;  %s506_s19 = sadd.s32 4294967294, %s785_s17   ;;  %s785_s17 = sphi %s827_s17, %s20_s17   ;;  %s781_s16 = sphi %s825_s16, %s1027_s16   ;;  %s777_s15 = sphi %s823_s15, %s1026_s15   ;;  %s773_s14 = sphi %s821_s14, %s1025_s14   ;;  %s769_s13 = sphi %s819_s13, %s1024_s13   ;;  %s765_s12 = sphi %s817_s12, %s1023_s12  }
   0x8   : > { %p52_p0 = scmp.ne.s32.totalorder %s769_s13, %s765_s12  ;;  %p851_p1 = scmp.eq.s32.totalorder %s505_s18, 0 }
   0x9   : > { %p855_p2 = scmp.eq.s32.totalorder %s505_s18, 1  ;;  %p136_p3 = scmp.eq.s32.totalorder %s506_s19, 1 }
   0xa   : > { %p861_p4 = por %p851_p1, %p52_p0  ;;  %p507_p5 = scmp.ge.s32.totalorder %s785_s17, 1 }
   0xb   : > { %p866_p6 = por %p136_p3, %p52_p0  ;;  %p143_p7 = scmp.lt.s32.totalorder %s785_s17, 3 }
   0xc   : > { %s1013_s22 = scalar_select %p861_p4, 1, 0 }
   0xd   : > { %s1014_s23 = scalar_select %p866_p6, 1, 0 }
   0xe   : > { %p871_p8 = pnand %p507_p5, %p143_p7  ;;  %s787_s25 = smov [#allocation5]  }
   0xf   : > { %s158_s26 = sshll.u32 %s787_s25, 4  ;;  %s29_s28 = sadd.s32 1, %s781_s16  ;;  %s159_s26 = int_to_ptr.vmem [resolvable:$true] %s158_s26 }
  0x10   : > { %p567_p9 = pneg %p871_p8  ;;  %s658_s29 = scalar_lea.vmem %s159_s26, 4096 }
  0x11   : > { %p659_p13 = scmp.ne.s32.totalorder %s159_s26, %s658_s29  ;;  %p666_p5 = scmp.lt.s32.totalorder %s159_s26, %s159_s26 }
  0x12   : > { %p880_p11 = pnand %p567_p9, %p851_p1  ;;  %p667_p7 = scmp.lt.s32.totalorder %s658_s29, %s658_s29 }
  0x14   : > { %p649_p12 = pneg %p880_p11  ;;  %p668_p6 = por %p667_p7, %p666_p5 }
  0x16   : > { %p661_p0 = pnand %p659_p13, %p649_p12 }
  0x18   : > { %p662_p3 = pneg %p661_p0 }
  0x1a   : > { %p669_p4 = pnand %p668_p6, %p662_p3 }
  0x1c   : > { %672 = shalt.err (!%p669_p4)
}
  0x1d   : > { %s788_s30 = smov 256   ;;  %s789_s4 = smov 16  }
  0x1e   : > { %570 = dma.hbm_to_vmem [thread:$0]  (!%p880_p11), %s1007_s1, 4096, %s159_s26, [#allocation6], %s788_s30, %s788_s30, %s789_s4  }
  0x1f   : > { %p30_p6 = scmp.ge.s32.totalorder %s29_s28, 2  ;;  %s39_s7 = sadd.s32 1, %s773_s14 }
  0x20   : > { %p46_p4 = scmp.ne.s32.totalorder %s773_s14, %s769_s13  ;;  %p47_p9 = scmp.eq.s32.totalorder %s785_s17, 0 }
  0x21   : > { %s1029_s28 = smov (%p30_p6, %s29_s28), 0  ;;  %p580_p0 = scmp.lt.s32.totalorder %s785_s17, 2 }
  0x22   : > { %p898_p12 = por %p47_p9, %p46_p4  ;;  %p904_p13 = por %p855_p2, %p46_p4 }
  0x23   : > { %s36_s10 = ssub.s32 %s781_s16, %s1029_s28  ;;  %s180_s11 = sand.u32 1, %s773_s14  }
  0x24   : > { %p37_p11 = scmp.eq.s32.totalorder %s36_s10, 0  ;;  %s511_s18 = sshll.u32 %s180_s11, 4 }
  0x25   : > { %s524_s25 = sshll.u32 %s781_s16, 8  ;;  %s184_s30 = scalar_lea.vmem [#allocation2], %s511_s18 }
  0x26   : > { %s913_s19 = scalar_select %p37_p11, %s773_s14, %s39_s7  }
  0x27   : > { %s190_s29 = scalar_lea.hbm %s1006_s0, %s524_s25  ;;  %s191_s4 = sshll.u32 %s184_s30, 4  ;;  %s192_s4 = int_to_ptr.vmem [resolvable:$true] %s191_s4 }
  0x28   : > { %p921_p2 = pnand %p580_p0, %p898_p12  ;;  %s181_s5 = scalar_lea.sflag [#allocation3], %s180_s11 }
  0x29   : > { %s686_s6 = scalar_lea.vmem %s192_s4, 256  ;;  %s790_s7 = smov [#allocation2]  }
  0x2a   : > { %p675_p3 = pneg %p921_p2  ;;  %p687_p5 = scmp.ne.s32.totalorder %s192_s4, %s686_s6 }
  0x2b   : > { %s691_s10 = sshll.u32 %s790_s7, 4  ;;  %s692_s10 = int_to_ptr.vmem [resolvable:$false] %s691_s10 }
  0x2c   : > { %p689_p7 = pnand %p687_p5, %p675_p3  ;;  %s693_s25 = scalar_lea.vmem %s692_s10, 512 }
  0x2d   : > { %p694_p4 = scmp.lt.s32.totalorder %s192_s4, %s692_s10  ;;  %p695_p9 = scmp.lt.s32.totalorder %s693_s25, %s686_s6 }
  0x2e   : > { %p690_p6 = pneg %p689_p7 }
  0x2f   : > { %p696_p11 = por %p695_p9, %p694_p4 }
  0x31   : > { %p697_p10 = pnand %p696_p11, %p690_p6 }
  0x33   : > { %700 = shalt.err (!%p697_p10)
}
  0x34   : > { %s791_s8 = smov 128   ;;  %s792_s18 = smov 8  }
  0x35   : > { %574 = dma.hbm_to_vmem [thread:$0]  (!%p921_p2), %s190_s29, 256, %s192_s4, %s181_s5, %s791_s8, %s791_s8, %s792_s18  }
  0x36   : > { %203 = sbr.rel (%p871_p8) target bundleno = 322 (0x142), region = 32  ;;  %s932_s11 = sand.u32 (!%p871_p8), 1, %s769_s13  }
  0x37   : > { %s515_s26 = sshll.u32 (!%p871_p8), %s932_s11, 4  ;;  %s206_s27 = scalar_lea.sflag (!%p871_p8), [#allocation3], %s932_s11 }
  0x38   : > { %s936_s30 = scalar_lea.vmem (!%p871_p8), [#allocation2], %s515_s26  ;;  %p1020_p12 = scmp.ne.s32.totalorder (!%p871_p8), %s1013_s22, 0 }
  0x3b   : > { %752 = dma.done.wait (%p1020_p12), %s206_s27, 256  }
  0x3c   : > { %754 = vsyncadd (%p1020_p12), %s206_s27, 4294967040 }
  0x3d   : > { %756 = dma.done.wait (%p851_p1), [#allocation6], 4096  }
  0x3e   : > { %758 = vsyncadd (%p851_p1), [#allocation6], 4294963200  ;;  %v793_v0 = vmov 0.0   ;;  %v282_v1 = vld [vmem:[#allocation5 + $0xf8] sm:$0xff]  ;;  %v281_v2 = vld [vmem:[#allocation5 + $0xf0] sm:$0xff]  ;;  %v285_v35 = vlaneseq  ;;  %s517_s24 = sshll.u32 %s932_s11, 5 }
  0x3f   : > { %359 = vmatprep.mubr.f32.mxu0 %v793_v0  ;;  %365 = vmatprep.mubr.f32.mxu1 %v793_v0  ;;  %v280_v3 = vld [vmem:[#allocation5 + $0xe8] sm:$0xff]  ;;  %v279_v4 = vld [vmem:[#allocation5 + $0xe0] sm:$0xff]  ;;  %v278_v5 = vld [vmem:[#allocation5 + $0xd8] sm:$0xff]  ;;  %s526_s29 = sshll.u32 %s777_s15, 9  ;;  %s239_s4 = scalar_lea.vmem [#allocation7], %s517_s24 }
  0x40   : > { %295 = vmatprep.subr.mxu0 %v282_v1  ;;  %527 = vmatprep.subr.mxu1 %v282_v1  ;;  %v277_v6 = vld [vmem:[#allocation5 + $0xd0] sm:$0xff]  ;;  %v276_v7 = vld [vmem:[#allocation5 + $0xc8] sm:$0xff]  ;;  %v275_v8 = vld [vmem:[#allocation5 + $0xc0] sm:$0xff]  ;;  %v286_v36 = vshrl.u32 %v285_v35, 7  ;;  %s397_s21 = sshll.u32 %s239_s4, 4  ;;  %s956_s7 = scalar_lea.hbm %s1009_s3, %s526_s29  ;;  %s958_s21 = int_to_ptr.vmem [resolvable:$true] %s397_s21 }
  0x41   : > { %296 = vmatpush1.msra.mxu0 %v281_v2  ;;  %543 = vmatpush1.msra.mxu1 %v281_v2  ;;  %v274_v9 = vld [vmem:[#allocation5 + $0xb8] sm:$0xff]  ;;  %v273_v10 = vld [vmem:[#allocation5 + $0xb0] sm:$0xff]  ;;  %v272_v11 = vld [vmem:[#allocation5 + $0xa8] sm:$0xff]  ;;  %s381_s15 = scalar_lea.sflag [#allocation4], %s932_s11  ;;  %s701_s10 = scalar_lea.vmem %s958_s21, 512 }
  0x42   : > { %297 = vmatprep.subr.mxu0 %v280_v3  ;;  %528 = vmatprep.subr.mxu1 %v280_v3  ;;  %v271_v12 = vld [vmem:[#allocation5 + $0xa0] sm:$0xff]  ;;  %v270_v13 = vld [vmem:[#allocation5 + $0x98] sm:$0xff]  ;;  %v269_v14 = vld [vmem:[#allocation5 + $0x90] sm:$0xff]  ;;  %v287_v37 = vsub.s32 0, %v286_v36  ;;  %v291_v39 = vsub.s32 1, %v286_v36  ;;  %p702_p1 = scmp.ne.s32.totalorder %s958_s21, %s701_s10  ;;  %s794_s25 = smov [#allocation7]  }
  0x43   : > { %298 = vmatpush1.msra.mxu0 %v279_v4  ;;  %544 = vmatpush1.msra.mxu1 %v279_v4  ;;  %v268_v15 = vld [vmem:[#allocation5 + $0x88] sm:$0xff]  ;;  %v267_v16 = vld [vmem:[#allocation5 + $0x80] sm:$0xff]  ;;  %v266_v17 = vld [vmem:[#allocation5 + $0x78] sm:$0xff]  ;;  %s705_s8 = sshll.u32 %s794_s25, 4  ;;  %s706_s8 = int_to_ptr.vmem [resolvable:$false] %s705_s8 }
  0x44   : > { %299 = vmatprep.subr.mxu0 %v278_v5  ;;  %529 = vmatprep.subr.mxu1 %v278_v5  ;;  %v265_v18 = vld [vmem:[#allocation5 + $0x70] sm:$0xff]  ;;  %v264_v19 = vld [vmem:[#allocation5 + $0x68] sm:$0xff]  ;;  %v263_v20 = vld [vmem:[#allocation5 + $0x60] sm:$0xff]  ;;  %p703_p8 = pnand %p702_p1, %p904_p13  ;;  %s707_s18 = scalar_lea.vmem %s706_s8, 1024 }
  0x45   : > { %300 = vmatpush1.msra.mxu0 %v277_v6  ;;  %545 = vmatpush1.msra.mxu1 %v277_v6  ;;  %v262_v21 = vld [vmem:[#allocation5 + $0x58] sm:$0xff]  ;;  %v261_v22 = vld [vmem:[#allocation5 + $0x50] sm:$0xff]  ;;  %v260_v23 = vld [vmem:[#allocation5 + $0x48] sm:$0xff]  ;;  %p708_p0 = scmp.lt.s32.totalorder %s958_s21, %s706_s8  ;;  %p709_p2 = scmp.lt.s32.totalorder %s707_s18, %s701_s10 }
  0x46   : > { %301 = vmatprep.subr.mxu0 %v276_v7  ;;  %530 = vmatprep.subr.mxu1 %v276_v7  ;;  %v259_v24 = vld [vmem:[#allocation5 + $0x40] sm:$0xff]  ;;  %v258_v25 = vld [vmem:[#allocation5 + $0x38] sm:$0xff]  ;;  %v257_v26 = vld [vmem:[#allocation5 + $0x30] sm:$0xff]  ;;  %p704_p10 = pneg %p703_p8 }
  0x47   : > { %302 = vmatpush1.msra.mxu0 %v275_v8  ;;  %546 = vmatpush1.msra.mxu1 %v275_v8  ;;  %v256_v27 = vld [vmem:[#allocation5 + $0x28] sm:$0xff]  ;;  %v255_v28 = vld [vmem:[#allocation5 + $0x20] sm:$0xff]  ;;  %v254_v29 = vld [vmem:[#allocation5 + $0x18] sm:$0xff]  ;;  %p710_p3 = por %p709_p2, %p708_p0 }
  0x48   : > { %303 = vmatprep.subr.mxu0 %v274_v9  ;;  %531 = vmatprep.subr.mxu1 %v274_v9  ;;  %v253_v30 = vld [vmem:[#allocation5 + $0x10] sm:$0xff]  ;;  %v252_v31 = vld [vmem:[#allocation5 + $0x8] sm:$0xff]  ;;  %v251_v32 = vld [vmem:[#allocation5] sm:$0xff] }
  0x49   : > { %304 = vmatpush1.msra.mxu0 %v273_v10  ;;  %547 = vmatpush1.msra.mxu1 %v273_v10  ;;  %v249_v33 = vld [vmem:[%s936_s30] sm:$0xff]  ;;  %v250_v34 = vld [vmem:[%s936_s30 + $0x8] sm:$0xff]  ;;  %p711_p5 = pnand %p710_p3, %p704_p10 }
  0x4a   : > { %305 = vmatprep.subr.mxu0 %v272_v11  ;;  %532 = vmatprep.subr.mxu1 %v272_v11  ;;  %v283_v38 = vld [vmem:[%s1008_s2] sm:$0x3] }
  0x4b   : > { %306 = vmatpush1.msra.mxu0 %v271_v12  ;;  %548 = vmatpush1.msra.mxu1 %v271_v12  ;;  %v288_v40 = vrot.slane %v283_v38, %v287_v37  ;;  %v292_v41 = vrot.slane %v283_v38, %v291_v39 }
  0x4c   : > { %307 = vmatprep.subr.mxu0 %v270_v13  ;;  %533 = vmatprep.subr.mxu1 %v270_v13 }
  0x4d   : > { %308 = vmatpush1.msra.mxu0 %v269_v14  ;;  %549 = vmatpush1.msra.mxu1 %v269_v14 }
  0x4e   : > { %309 = vmatprep.subr.mxu0 %v268_v15  ;;  %534 = vmatprep.subr.mxu1 %v268_v15 }
  0x4f   : > { %310 = vmatpush1.msra.mxu0 %v267_v16  ;;  %550 = vmatpush1.msra.mxu1 %v267_v16 }
  0x50   : > { %311 = vmatprep.subr.mxu0 %v266_v17  ;;  %535 = vmatprep.subr.mxu1 %v266_v17 }
  0x51   : > { %312 = vmatpush1.msra.mxu0 %v265_v18  ;;  %551 = vmatpush1.msra.mxu1 %v265_v18 }
  0x52   : > { %313 = vmatprep.subr.mxu0 %v264_v19  ;;  %536 = vmatprep.subr.mxu1 %v264_v19 }
  0x53   : > { %314 = vmatpush1.msra.mxu0 %v263_v20  ;;  %552 = vmatpush1.msra.mxu1 %v263_v20 }
  0x54   : > { %315 = vmatprep.subr.mxu0 %v262_v21  ;;  %537 = vmatprep.subr.mxu1 %v262_v21 }
  0x55   : > { %316 = vmatpush1.msra.mxu0 %v261_v22  ;;  %553 = vmatpush1.msra.mxu1 %v261_v22 }
  0x56   : > { %317 = vmatprep.subr.mxu0 %v260_v23  ;;  %538 = vmatprep.subr.mxu1 %v260_v23 }
  0x57   : > { %318 = vmatpush1.msra.mxu0 %v259_v24  ;;  %554 = vmatpush1.msra.mxu1 %v259_v24 }
  0x58   : > { %319 = vmatprep.subr.mxu0 %v258_v25  ;;  %539 = vmatprep.subr.mxu1 %v258_v25 }
  0x59   : > { %320 = vmatpush1.msra.mxu0 %v257_v26  ;;  %555 = vmatpush1.msra.mxu1 %v257_v26 }
  0x5a   : > { %321 = vmatprep.subr.mxu0 %v256_v27  ;;  %540 = vmatprep.subr.mxu1 %v256_v27 }
  0x5b   : > { %322 = vmatpush1.msra.mxu0 %v255_v28  ;;  %556 = vmatpush1.msra.mxu1 %v255_v28 }
  0x5c   : > { %323 = vmatprep.subr.mxu0 %v254_v29  ;;  %541 = vmatprep.subr.mxu1 %v254_v29 }
  0x5d   : > { %324 = vmatpush1.msra.mxu0 %v253_v30  ;;  %557 = vmatpush1.msra.mxu1 %v253_v30 }
  0x5e   : > { %325 = vmatprep.subr.mxu0 %v252_v31  ;;  %542 = vmatprep.subr.mxu1 %v252_v31 }
  0x5f   : > { %326 = vmatpush1.msra.mxu0 %v251_v32  ;;  %558 = vmatpush1.msra.mxu1 %v251_v32 }
  0x60   : > { %360 = vmatmul.mubr.f32.vlgmr.msra.gmra.mxu0 %v249_v33  ;;  %366 = vmatmul.mubr.f32.vlgmr.msra.gmra.mxu1 %v250_v34 }
 0x120   : > { %v361_v42 = vpop.f32.mrf.mxu0  ;;  %v367_v43 = vpop.f32.mrf.mxu1 }
 0x121   : > { %v362_v44 = vadd.f32 %v361_v42, %v288_v40  ;;  %v368_v45 = vadd.f32 %v367_v43, %v288_v40 }
 0x122   : > { %v363_v46 = vpop.f32.mrf.mxu0  ;;  %v369_v47 = vpop.f32.mrf.mxu1 }
 0x123   : > { %639 = vtanh.f32 %v362_v44  ;;  %v364_v48 = vadd.f32 %v363_v46, %v292_v41  ;;  %v370_v49 = vadd.f32 %v369_v47, %v292_v41 }
 0x124   : > { %641 = vtanh.f32 %v368_v45 }
 0x125   : > { %643 = vtanh.f32 %v364_v48 }
 0x126   : > { %645 = vtanh.f32 %v370_v49 }
 0x130   : > { %v640_v50 = vpop.eup %639 }
 0x131   : > { %v642_v51 = vpop.eup %641  ;;  %376 = vst [vmem:[%s239_s4] sm:$0xff] %v640_v50 }
 0x132   : > { %v644_v52 = vpop.eup %643  ;;  %378 = vst [vmem:[%s239_s4 + $0x10] sm:$0xff] %v642_v51 }
 0x133   : > { %v646_v53 = vpop.eup %645  ;;  %377 = vst [vmem:[%s239_s4 + $0x8] sm:$0xff] %v644_v52 }
 0x134   : > { %379 = vst [vmem:[%s239_s4 + $0x18] sm:$0xff] %v646_v53 }
 0x135   : > { %714 = shalt.err (!%p711_p5)
}
 0x136   : > { %s715_s26 = scalar_lea.hbm %s956_s7, 512  ;;  %s719_s20 = scalar_lea.hbm %s1009_s3, 1024 }
 0x137   : > { %p716_p7 = scmp.ne.s32.totalorder %s956_s7, %s715_s26  ;;  %p720_p9 = scmp.lt.s32.totalorder %s956_s7, %s1009_s3 }
 0x138   : > { %p721_p11 = scmp.lt.s32.totalorder %s719_s20, %s715_s26 }
 0x139   : > { %p717_p6 = pnand %p716_p7, %p904_p13 }
 0x13a   : > { %p722_p12 = por %p721_p11, %p720_p9 }
 0x13b   : > { %p718_p4 = pneg %p717_p6 }
 0x13d   : > { %p723_p1 = pnand %p722_p12, %p718_p4 }
 0x13f   : > { %726 = shalt.err (!%p723_p1)
}
 0x140   : > { %s795_s29 = smov 256   ;;  %s796_s4 = smov 16  }
 0x141   : > { %565 = dma.vmem_to_hbm [thread:$0]  (%p904_p13), %s958_s21, 512, %s956_s7, %s381_s15, %s795_s29, %s795_s29, %s796_s4  }
 0x142 PF: > { %s412_s5 = sand.u32 1, %s765_s12   ;;  %p1021_p8 = scmp.ne.s32.totalorder %s1014_s23, 0 }
 0x143   : > { %p1022_p10 = scmp.ge.s32.totalorder %s785_s17, 2  ;;  %s413_s6 = scalar_lea.sflag [#allocation4], %s412_s5 }
 0x145   : > { %p576_p0 = pnand %p1022_p10, %p1021_p8 }
 0x147   : > { %p577_p2 = pneg %p576_p0 }
 0x149   : > { %760 = dma.done.wait (%p577_p2), %s413_s6, 512  }
 0x14a   : > { %762 = vsyncadd (%p577_p2), %s413_s6, 4294966784  ;;  %s20_s17 = sadd.s32 1, %s785_s17   ;;  %s1023_s12 = smov %s769_s13 }
 0x14b   : > { %p17_p3 = scmp.ge.s32.totalorder %s20_s17, 4   ;;  %s1024_s13 = smov %s773_s14 }
 0x14c   : > { %s1025_s14 = smov %s913_s19  ;;  %s1026_s15 = smov %s781_s16 }
 0x14d   : > { %s1027_s16 = smov %s1029_s28  ;;  %19 = sbr.rel (!%p17_p3) target bundleno = 7 (0x7), region = 85 }
 0x152   :  { %418 = vsyncpa [#allocation3], 1 }
 0x153   :  { %420 = vsyncpa [#allocation3 + $0x1], 1 }
 0x154   :  { %421 = vsyncpa [#allocation6], 1 }
 0x155   :  { %422 = vsyncpa [#allocation4], 1 }
 0x156   :  { %424 = vsyncpa [#allocation4 + $0x1], 1 }

// kernel: tpu_custom_call.1
= control target key start
LH: loop header
LB: loop body
LE: loop exit
PB: predicated region body
PF: predicated region fallthrough
CT: control target
= control target key end

     0   :  { %8 = vsyncpa [#allocation3], 0  ;;  %s1006_s0 = inlined_call_operand.hbm [shape: f32[32,128], index: 0, kind: input, shape index: {}]   ;;  %s1007_s1 = inlined_call_operand.hbm [shape: f32[128,256], index: 1, kind: input, shape index: {}]   ;;  %s1008_s2 = inlined_call_operand.vmem [shape: f32[1,256], index: 2, kind: input, shape index: {}]   ;;  %s1009_s3 = inlined_call_operand.hbm [shape: f32[32,256], index: 3, kind: output, shape index: {}]  }
   0x1   :  { %10 = vsyncpa [#allocation3 + $0x1], 0 }
   0x2   :  { %11 = vsyncpa [#allocation6], 0 }
   0x3   :  { %12 = vsyncpa [#allocation4], 0 }
   0x4   :  { %14 = vsyncpa [#allocation4 + $0x1], 0  ;;  %s817_s12 = smov 0   ;;  %s819_s13 = smov 0  }
   0x5   :  { %s821_s14 = smov 0   ;;  %s823_s15 = smov 0  }
   0x6   :  { %s825_s16 = smov 0   ;;  %s827_s17 = smov 0  }
   0x7 LB: > { %s505_s18 = sadd.s32 4294967295, %s785_s17   ;;  %s506_s19 = sadd.s32 4294967294, %s785_s17   ;;  %s785_s17 = sphi %s827_s17, %s20_s17   ;;  %s781_s16 = sphi %s825_s16, %s1027_s16   ;;  %s777_s15 = sphi %s823_s15, %s1026_s15   ;;  %s773_s14 = sphi %s821_s14, %s1025_s14   ;;  %s769_s13 = sphi %s819_s13, %s1024_s13   ;;  %s765_s12 = sphi %s817_s12, %s1023_s12  }
   0x8   : > { %p52_p0 = scmp.ne.s32.totalorder %s769_s13, %s765_s12  ;;  %p851_p1 = scmp.eq.s32.totalorder %s505_s18, 0 }
   0x9   : > { %p855_p2 = scmp.eq.s32.totalorder %s505_s18, 1  ;;  %p136_p3 = scmp.eq.s32.totalorder %s506_s19, 1 }
   0xa   : > { %p861_p4 = por %p851_p1, %p52_p0  ;;  %p507_p5 = scmp.ge.s32.totalorder %s785_s17, 1 }
   0xb   : > { %p866_p6 = por %p136_p3, %p52_p0  ;;  %p143_p7 = scmp.lt.s32.totalorder %s785_s17, 3 }
   0xc   : > { %s1013_s22 = scalar_select %p861_p4, 1, 0 }
   0xd   : > { %s1014_s23 = scalar_select %p866_p6, 1, 0 }
   0xe   : > { %p871_p8 = pnand %p507_p5, %p143_p7  ;;  %s787_s25 = smov [#allocation5]  }
   0xf   : > { %s158_s26 = sshll.u32 %s787_s25, 4  ;;  %s29_s28 = sadd.s32 1, %s781_s16  ;;  %s159_s26 = int_to_ptr.vmem [resolvable:$true] %s158_s26 }
  0x10   : > { %p567_p9 = pneg %p871_p8  ;;  %s658_s29 = scalar_lea.vmem %s159_s26, 4096 }
  0x11   : > { %p659_p13 = scmp.ne.s32.totalorder %s159_s26, %s658_s29  ;;  %p666_p5 = scmp.lt.s32.totalorder %s159_s26, %s159_s26 }
  0x12   : > { %p880_p11 = pnand %p567_p9, %p851_p1  ;;  %p667_p7 = scmp.lt.s32.totalorder %s658_s29, %s658_s29 }
  0x14   : > { %p649_p12 = pneg %p880_p11  ;;  %p668_p6 = por %p667_p7, %p666_p5 }
  0x16   : > { %p661_p0 = pnand %p659_p13, %p649_p12 }
  0x18   : > { %p662_p3 = pneg %p661_p0 }
  0x1a   : > { %p669_p4 = pnand %p668_p6, %p662_p3 }
  0x1c   : > { %672 = shalt.err (!%p669_p4)
}
  0x1d   : > { %s788_s30 = smov 256   ;;  %s789_s4 = smov 16  }
  0x1e   : > { %570 = dma.hbm_to_vmem [thread:$0]  (!%p880_p11), %s1007_s1, 4096, %s159_s26, [#allocation6], %s788_s30, %s788_s30, %s789_s4  }
  0x1f   : > { %p30_p6 = scmp.ge.s32.totalorder %s29_s28, 2  ;;  %s39_s7 = sadd.s32 1, %s773_s14 }
  0x20   : > { %p46_p4 = scmp.ne.s32.totalorder %s773_s14, %s769_s13  ;;  %p47_p9 = scmp.eq.s32.totalorder %s785_s17, 0 }
  0x21   : > { %s1029_s28 = smov (%p30_p6, %s29_s28), 0  ;;  %p580_p0 = scmp.lt.s32.totalorder %s785_s17, 2 }
  0x22   : > { %p898_p12 = por %p47_p9, %p46_p4  ;;  %p904_p13 = por %p855_p2, %p46_p4 }
  0x23   : > { %s36_s10 = ssub.s32 %s781_s16, %s1029_s28  ;;  %s180_s11 = sand.u32 1, %s773_s14  }
  0x24   : > { %p37_p11 = scmp.eq.s32.totalorder %s36_s10, 0  ;;  %s511_s18 = sshll.u32 %s180_s11, 4 }
  0x25   : > { %s524_s25 = sshll.u32 %s781_s16, 8  ;;  %s184_s30 = scalar_lea.vmem [#allocation2], %s511_s18 }
  0x26   : > { %s913_s19 = scalar_select %p37_p11, %s773_s14, %s39_s7  }
  0x27   : > { %s190_s29 = scalar_lea.hbm %s1006_s0, %s524_s25  ;;  %s191_s4 = sshll.u32 %s184_s30, 4  ;;  %s192_s4 = int_to_ptr.vmem [resolvable:$true] %s191_s4 }
  0x28   : > { %p921_p2 = pnand %p580_p0, %p898_p12  ;;  %s181_s5 = scalar_lea.sflag [#allocation3], %s180_s11 }
  0x29   : > { %s686_s6 = scalar_lea.vmem %s192_s4, 256  ;;  %s790_s7 = smov [#allocation2]  }
  0x2a   : > { %p675_p3 = pneg %p921_p2  ;;  %p687_p5 = scmp.ne.s32.totalorder %s192_s4, %s686_s6 }
  0x2b   : > { %s691_s10 = sshll.u32 %s790_s7, 4  ;;  %s692_s10 = int_to_ptr.vmem [resolvable:$false] %s691_s10 }
  0x2c   : > { %p689_p7 = pnand %p687_p5, %p675_p3  ;;  %s693_s25 = scalar_lea.vmem %s692_s10, 512 }
  0x2d   : > { %p694_p4 = scmp.lt.s32.totalorder %s192_s4, %s692_s10  ;;  %p695_p9 = scmp.lt.s32.totalorder %s693_s25, %s686_s6 }
  0x2e   : > { %p690_p6 = pneg %p689_p7 }
  0x2f   : > { %p696_p11 = por %p695_p9, %p694_p4 }
  0x31   : > { %p697_p10 = pnand %p696_p11, %p690_p6 }
  0x33   : > { %700 = shalt.err (!%p697_p10)
}
  0x34   : > { %s791_s8 = smov 128   ;;  %s792_s18 = smov 8  }
  0x35   : > { %574 = dma.hbm_to_vmem [thread:$0]  (!%p921_p2), %s190_s29, 256, %s192_s4, %s181_s5, %s791_s8, %s791_s8, %s792_s18  }
  0x36   : > { %203 = sbr.rel (%p871_p8) target bundleno = 322 (0x142), region = 32  ;;  %s932_s11 = sand.u32 (!%p871_p8), 1, %s769_s13  }
  0x37   : > { %s515_s26 = sshll.u32 (!%p871_p8), %s932_s11, 4  ;;  %s206_s27 = scalar_lea.sflag (!%p871_p8), [#allocation3], %s932_s11 }
  0x38   : > { %s936_s30 = scalar_lea.vmem (!%p871_p8), [#allocation2], %s515_s26  ;;  %p1020_p12 = scmp.ne.s32.totalorder (!%p871_p8), %s1013_s22, 0 }
  0x3b   : > { %752 = dma.done.wait (%p1020_p12), %s206_s27, 256  }
  0x3c   : > { %754 = vsyncadd (%p1020_p12), %s206_s27, 4294967040 }
  0x3d   : > { %756 = dma.done.wait (%p851_p1), [#allocation6], 4096  }
  0x3e   : > { %758 = vsyncadd (%p851_p1), [#allocation6], 4294963200  ;;  %v793_v0 = vmov 0.0   ;;  %v282_v1 = vld [vmem:[#allocation5 + $0xf8] sm:$0xff]  ;;  %v281_v2 = vld [vmem:[#allocation5 + $0xf0] sm:$0xff]  ;;  %v285_v35 = vlaneseq  ;;  %s517_s24 = sshll.u32 %s932_s11, 5 }
  0x3f   : > { %359 = vmatprep.mubr.f32.mxu0 %v793_v0  ;;  %365 = vmatprep.mubr.f32.mxu1 %v793_v0  ;;  %v280_v3 = vld [vmem:[#allocation5 + $0xe8] sm:$0xff]  ;;  %v279_v4 = vld [vmem:[#allocation5 + $0xe0] sm:$0xff]  ;;  %v278_v5 = vld [vmem:[#allocation5 + $0xd8] sm:$0xff]  ;;  %s526_s29 = sshll.u32 %s777_s15, 9  ;;  %s239_s4 = scalar_lea.vmem [#allocation7], %s517_s24 }
  0x40   : > { %295 = vmatprep.subr.mxu0 %v282_v1  ;;  %527 = vmatprep.subr.mxu1 %v282_v1  ;;  %v277_v6 = vld [vmem:[#allocation5 + $0xd0] sm:$0xff]  ;;  %v276_v7 = vld [vmem:[#allocation5 + $0xc8] sm:$0xff]  ;;  %v275_v8 = vld [vmem:[#allocation5 + $0xc0] sm:$0xff]  ;;  %v286_v36 = vshrl.u32 %v285_v35, 7  ;;  %s397_s21 = sshll.u32 %s239_s4, 4  ;;  %s956_s7 = scalar_lea.hbm %s1009_s3, %s526_s29  ;;  %s958_s21 = int_to_ptr.vmem [resolvable:$true] %s397_s21 }
  0x41   : > { %296 = vmatpush1.msra.mxu0 %v281_v2  ;;  %543 = vmatpush1.msra.mxu1 %v281_v2  ;;  %v274_v9 = vld [vmem:[#allocation5 + $0xb8] sm:$0xff]  ;;  %v273_v10 = vld [vmem:[#allocation5 + $0xb0] sm:$0xff]  ;;  %v272_v11 = vld [vmem:[#allocation5 + $0xa8] sm:$0xff]  ;;  %s381_s15 = scalar_lea.sflag [#allocation4], %s932_s11  ;;  %s701_s10 = scalar_lea.vmem %s958_s21, 512 }
  0x42   : > { %297 = vmatprep.subr.mxu0 %v280_v3  ;;  %528 = vmatprep.subr.mxu1 %v280_v3  ;;  %v271_v12 = vld [vmem:[#allocation5 + $0xa0] sm:$0xff]  ;;  %v270_v13 = vld [vmem:[#allocation5 + $0x98] sm:$0xff]  ;;  %v269_v14 = vld [vmem:[#allocation5 + $0x90] sm:$0xff]  ;;  %v287_v37 = vsub.s32 0, %v286_v36  ;;  %v291_v39 = vsub.s32 1, %v286_v36  ;;  %p702_p1 = scmp.ne.s32.totalorder %s958_s21, %s701_s10  ;;  %s794_s25 = smov [#allocation7]  }
  0x43   : > { %298 = vmatpush1.msra.mxu0 %v279_v4  ;;  %544 = vmatpush1.msra.mxu1 %v279_v4  ;;  %v268_v15 = vld [vmem:[#allocation5 + $0x88] sm:$0xff]  ;;  %v267_v16 = vld [vmem:[#allocation5 + $0x80] sm:$0xff]  ;;  %v266_v17 = vld [vmem:[#allocation5 + $0x78] sm:$0xff]  ;;  %s705_s8 = sshll.u32 %s794_s25, 4  ;;  %s706_s8 = int_to_ptr.vmem [resolvable:$false] %s705_s8 }
  0x44   : > { %299 = vmatprep.subr.mxu0 %v278_v5  ;;  %529 = vmatprep.subr.mxu1 %v278_v5  ;;  %v265_v18 = vld [vmem:[#allocation5 + $0x70] sm:$0xff]  ;;  %v264_v19 = vld [vmem:[#allocation5 + $0x68] sm:$0xff]  ;;  %v263_v20 = vld [vmem:[#allocation5 + $0x60] sm:$0xff]  ;;  %p703_p8 = pnand %p702_p1, %p904_p13  ;;  %s707_s18 = scalar_lea.vmem %s706_s8, 1024 }
  0x45   : > { %300 = vmatpush1.msra.mxu0 %v277_v6  ;;  %545 = vmatpush1.msra.mxu1 %v277_v6  ;;  %v262_v21 = vld [vmem:[#allocation5 + $0x58] sm:$0xff]  ;;  %v261_v22 = vld [vmem:[#allocation5 + $0x50] sm:$0xff]  ;;  %v260_v23 = vld [vmem:[#allocation5 + $0x48] sm:$0xff]  ;;  %p708_p0 = scmp.lt.s32.totalorder %s958_s21, %s706_s8  ;;  %p709_p2 = scmp.lt.s32.totalorder %s707_s18, %s701_s10 }
  0x46   : > { %301 = vmatprep.subr.mxu0 %v276_v7  ;;  %530 = vmatprep.subr.mxu1 %v276_v7  ;;  %v259_v24 = vld [vmem:[#allocation5 + $0x40] sm:$0xff]  ;;  %v258_v25 = vld [vmem:[#allocation5 + $0x38] sm:$0xff]  ;;  %v257_v26 = vld [vmem:[#allocation5 + $0x30] sm:$0xff]  ;;  %p704_p10 = pneg %p703_p8 }
  0x47   : > { %302 = vmatpush1.msra.mxu0 %v275_v8  ;;  %546 = vmatpush1.msra.mxu1 %v275_v8  ;;  %v256_v27 = vld [vmem:[#allocation5 + $0x28] sm:$0xff]  ;;  %v255_v28 = vld [vmem:[#allocation5 + $0x20] sm:$0xff]  ;;  %v254_v29 = vld [vmem:[#allocation5 + $0x18] sm:$0xff]  ;;  %p710_p3 = por %p709_p2, %p708_p0 }
  0x48   : > { %303 = vmatprep.subr.mxu0 %v274_v9  ;;  %531 = vmatprep.subr.mxu1 %v274_v9  ;;  %v253_v30 = vld [vmem:[#allocation5 + $0x10] sm:$0xff]  ;;  %v252_v31 = vld [vmem:[#allocation5 + $0x8] sm:$0xff]  ;;  %v251_v32 = vld [vmem:[#allocation5] sm:$0xff] }
  0x49   : > { %304 = vmatpush1.msra.mxu0 %v273_v10  ;;  %547 = vmatpush1.msra.mxu1 %v273_v10  ;;  %v249_v33 = vld [vmem:[%s936_s30] sm:$0xff]  ;;  %v250_v34 = vld [vmem:[%s936_s30 + $0x8] sm:$0xff]  ;;  %p711_p5 = pnand %p710_p3, %p704_p10 }
  0x4a   : > { %305 = vmatprep.subr.mxu0 %v272_v11  ;;  %532 = vmatprep.subr.mxu1 %v272_v11  ;;  %v283_v38 = vld [vmem:[%s1008_s2] sm:$0x3] }
  0x4b   : > { %306 = vmatpush1.msra.mxu0 %v271_v12  ;;  %548 = vmatpush1.msra.mxu1 %v271_v12  ;;  %v288_v40 = vrot.slane %v283_v38, %v287_v37  ;;  %v292_v41 = vrot.slane %v283_v38, %v291_v39 }
  0x4c   : > { %307 = vmatprep.subr.mxu0 %v270_v13  ;;  %533 = vmatprep.subr.mxu1 %v270_v13 }
  0x4d   : > { %308 = vmatpush1.msra.mxu0 %v269_v14  ;;  %549 = vmatpush1.msra.mxu1 %v269_v14 }
  0x4e   : > { %309 = vmatprep.subr.mxu0 %v268_v15  ;;  %534 = vmatprep.subr.mxu1 %v268_v15 }
  0x4f   : > { %310 = vmatpush1.msra.mxu0 %v267_v16  ;;  %550 = vmatpush1.msra.mxu1 %v267_v16 }
  0x50   : > { %311 = vmatprep.subr.mxu0 %v266_v17  ;;  %535 = vmatprep.subr.mxu1 %v266_v17 }
  0x51   : > { %312 = vmatpush1.msra.mxu0 %v265_v18  ;;  %551 = vmatpush1.msra.mxu1 %v265_v18 }
  0x52   : > { %313 = vmatprep.subr.mxu0 %v264_v19  ;;  %536 = vmatprep.subr.mxu1 %v264_v19 }
  0x53   : > { %314 = vmatpush1.msra.mxu0 %v263_v20  ;;  %552 = vmatpush1.msra.mxu1 %v263_v20 }
  0x54   : > { %315 = vmatprep.subr.mxu0 %v262_v21  ;;  %537 = vmatprep.subr.mxu1 %v262_v21 }
  0x55   : > { %316 = vmatpush1.msra.mxu0 %v261_v22  ;;  %553 = vmatpush1.msra.mxu1 %v261_v22 }
  0x56   : > { %317 = vmatprep.subr.mxu0 %v260_v23  ;;  %538 = vmatprep.subr.mxu1 %v260_v23 }
  0x57   : > { %318 = vmatpush1.msra.mxu0 %v259_v24  ;;  %554 = vmatpush1.msra.mxu1 %v259_v24 }
  0x58   : > { %319 = vmatprep.subr.mxu0 %v258_v25  ;;  %539 = vmatprep.subr.mxu1 %v258_v25 }
  0x59   : > { %320 = vmatpush1.msra.mxu0 %v257_v26  ;;  %555 = vmatpush1.msra.mxu1 %v257_v26 }
  0x5a   : > { %321 = vmatprep.subr.mxu0 %v256_v27  ;;  %540 = vmatprep.subr.mxu1 %v256_v27 }
  0x5b   : > { %322 = vmatpush1.msra.mxu0 %v255_v28  ;;  %556 = vmatpush1.msra.mxu1 %v255_v28 }
  0x5c   : > { %323 = vmatprep.subr.mxu0 %v254_v29  ;;  %541 = vmatprep.subr.mxu1 %v254_v29 }
  0x5d   : > { %324 = vmatpush1.msra.mxu0 %v253_v30  ;;  %557 = vmatpush1.msra.mxu1 %v253_v30 }
  0x5e   : > { %325 = vmatprep.subr.mxu0 %v252_v31  ;;  %542 = vmatprep.subr.mxu1 %v252_v31 }
  0x5f   : > { %326 = vmatpush1.msra.mxu0 %v251_v32  ;;  %558 = vmatpush1.msra.mxu1 %v251_v32 }
  0x60   : > { %360 = vmatmul.mubr.f32.vlgmr.msra.gmra.mxu0 %v249_v33  ;;  %366 = vmatmul.mubr.f32.vlgmr.msra.gmra.mxu1 %v250_v34 }
 0x120   : > { %v361_v42 = vpop.f32.mrf.mxu0  ;;  %v367_v43 = vpop.f32.mrf.mxu1 }
 0x121   : > { %v362_v44 = vadd.f32 %v361_v42, %v288_v40  ;;  %v368_v45 = vadd.f32 %v367_v43, %v288_v40 }
 0x122   : > { %v363_v46 = vpop.f32.mrf.mxu0  ;;  %v369_v47 = vpop.f32.mrf.mxu1 }
 0x123   : > { %639 = vtanh.f32 %v362_v44  ;;  %v364_v48 = vadd.f32 %v363_v46, %v292_v41  ;;  %v370_v49 = vadd.f32 %v369_v47, %v292_v41 }
 0x124   : > { %641 = vtanh.f32 %v368_v45 }
 0x125   : > { %643 = vtanh.f32 %v364_v48 }
 0x126   : > { %645 = vtanh.f32 %v370_v49 }
 0x130   : > { %v640_v50 = vpop.eup %639 }
 0x131   : > { %v642_v51 = vpop.eup %641  ;;  %376 = vst [vmem:[%s239_s4] sm:$0xff] %v640_v50 }
 0x132   : > { %v644_v52 = vpop.eup %643  ;;  %378 = vst [vmem:[%s239_s4 + $0x10] sm:$0xff] %v642_v51 }
 0x133   : > { %v646_v53 = vpop.eup %645  ;;  %377 = vst [vmem:[%s239_s4 + $0x8] sm:$0xff] %v644_v52 }
 0x134   : > { %379 = vst [vmem:[%s239_s4 + $0x18] sm:$0xff] %v646_v53 }
 0x135   : > { %714 = shalt.err (!%p711_p5)
}
 0x136   : > { %s715_s26 = scalar_lea.hbm %s956_s7, 512  ;;  %s719_s20 = scalar_lea.hbm %s1009_s3, 1024 }
 0x137   : > { %p716_p7 = scmp.ne.s32.totalorder %s956_s7, %s715_s26  ;;  %p720_p9 = scmp.lt.s32.totalorder %s956_s7, %s1009_s3 }
 0x138   : > { %p721_p11 = scmp.lt.s32.totalorder %s719_s20, %s715_s26 }
 0x139   : > { %p717_p6 = pnand %p716_p7, %p904_p13 }
 0x13a   : > { %p722_p12 = por %p721_p11, %p720_p9 }
 0x13b   : > { %p718_p4 = pneg %p717_p6 }
 0x13d   : > { %p723_p1 = pnand %p722_p12, %p718_p4 }
 0x13f   : > { %726 = shalt.err (!%p723_p1)
}
 0x140   : > { %s795_s29 = smov 256   ;;  %s796_s4 = smov 16  }
 0x141   : > { %565 = dma.vmem_to_hbm [thread:$0]  (%p904_p13), %s958_s21, 512, %s956_s7, %s381_s15, %s795_s29, %s795_s29, %s796_s4  }
 0x142 PF: > { %s412_s5 = sand.u32 1, %s765_s12   ;;  %p1021_p8 = scmp.ne.s32.totalorder %s1014_s23, 0 }
 0x143   : > { %p1022_p10 = scmp.ge.s32.totalorder %s785_s17, 2  ;;  %s413_s6 = scalar_lea.sflag [#allocation4], %s412_s5 }
 0x145   : > { %p576_p0 = pnand %p1022_p10, %p1021_p8 }
 0x147   : > { %p577_p2 = pneg %p576_p0 }
 0x149   : > { %760 = dma.done.wait (%p577_p2), %s413_s6, 512  }
 0x14a   : > { %762 = vsyncadd (%p577_p2), %s413_s6, 4294966784  ;;  %s20_s17 = sadd.s32 1, %s785_s17   ;;  %s1023_s12 = smov %s769_s13 }
 0x14b   : > { %p17_p3 = scmp.ge.s32.totalorder %s20_s17, 4   ;;  %s1024_s13 = smov %s773_s14 }
 0x14c   : > { %s1025_s14 = smov %s913_s19  ;;  %s1026_s15 = smov %s781_s16 }
 0x14d   : > { %s1027_s16 = smov %s1029_s28  ;;  %19 = sbr.rel (!%p17_p3) target bundleno = 7 (0x7), region = 85 }
 0x152   :  { %418 = vsyncpa [#allocation3], 1 }
 0x153   :  { %420 = vsyncpa [#allocation3 + $0x1], 1 }
 0x154   :  { %421 = vsyncpa [#allocation6], 1 }
 0x155   :  { %422 = vsyncpa [#allocation4], 1 }
 0x156   :  { %424 = vsyncpa [#allocation4 + $0x1], 1 }

</bundles_post_ra>
